<compile_context>
chip_gen: v7x
topology: tpu7x:2x2x1
jax: 0.10.0
libtpu: 0.0.40
codegen_flags: <defaults>
</compile_context>

<pallas_src>
import math

import jax
import jax.numpy as jnp
from jax.experimental import pallas as pl
from jax.experimental.pallas import tpu as pltpu


def _layer_scale_kernel(x_ref, gamma_ref, o_ref):
    # x_ref: (TILE_ROWS, Cf) VMEM tile; gamma_ref: (1, Cf) resident broadcast row.
    # Single VPU multiply per vreg; gamma broadcasts along sublanes.
    o_ref[...] = (x_ref[...] * gamma_ref[...]).astype(o_ref.dtype)


def _chip_budget():
    """(target block bytes per buffer, scoped VMEM limit) by TPU generation."""
    try:
        kind = jax.devices()[0].device_kind.lower()
    except Exception:
        kind = ""
    if "v7" in kind:
        # v7x: ~3.2 TB/s HBM per TC but only 64 MiB physical VMEM.
        # 8 MiB blocks x 2 bufs x (x + out) = 32 MiB -> request 48 MiB scoped.
        return 8 << 20, 48 << 20
    # v5e/v6e (and fallback): 4 MiB blocks. Must raise the scoped limit on v5e
    # (16 MiB default); 32 MiB is safe on every generation's physical VMEM.
    return 4 << 20, 32 << 20


def _pallas_layer_scale_2d(
    x2d: jax.Array,
    gamma_row: jax.Array,
    *,
    tile_rows: int,
    vmem_limit_bytes: int,
) -> jax.Array:
    M, Cf = x2d.shape
    nbytes = M * Cf * x2d.dtype.itemsize
    grid = (pl.cdiv(M, tile_rows),)

    return pl.pallas_call(
        _layer_scale_kernel,
        out_shape=jax.ShapeDtypeStruct((M, Cf), x2d.dtype),
        grid=grid,
        in_specs=[
            # row-tiled, lane-dense x block
            pl.BlockSpec((tile_rows, Cf), lambda i: (i, 0)),
            # gamma: same (1, Cf) block every step, stays resident in VMEM
            pl.BlockSpec((1, Cf), lambda i: (0, 0)),
        ],
        out_specs=pl.BlockSpec((tile_rows, Cf), lambda i: (i, 0)),
        compiler_params=pltpu.CompilerParams(
            dimension_semantics=("parallel",),  # megacore-shardable row grid
            vmem_limit_bytes=vmem_limit_bytes,
        ),
        cost_estimate=pl.CostEstimate(
            flops=M * Cf,
            transcendentals=0,
            bytes_accessed=2 * nbytes + gamma_row.size * gamma_row.dtype.itemsize,
        ),
    )(x2d, gamma_row)


def layer_scale(
    x: jax.Array,
    gamma: jax.Array,
    *,
    min_elements_for_pallas: int = 256 * 1024,
    target_block_bytes: int | None = None,
) -> jax.Array:
    """LayerScale forward: x * gamma with gamma broadcast over the last dim."""
    orig_shape = x.shape
    C = orig_shape[-1]
    assert gamma.shape == (C,), f"gamma must be ({C},), got {gamma.shape}"

    # Match dtypes so the kernel does one same-dtype vmul.
    # NOTE: for bf16 x this deviates from PyTorch's bf16*f32 -> f32 promotion;
    # acceptable for LayerScale magnitudes (~1e-5).
    gamma = gamma.astype(x.dtype)

    total = x.size
    if total < min_elements_for_pallas:
        # Tiny inputs: pallas_call + DMA setup dwarfs the work; let XLA fuse it.
        return x * gamma

    # Fold the trailing dim up to a multiple of 128 lanes for unmasked stores.
    Cf = (C * 128) // math.gcd(C, 128)  # lcm(C, 128)
    fold = Cf // C
    lead = total // C  # product of all leading dims
    if lead % fold != 0:
        # Awkward shape: cannot fold cleanly to a lane-dense view.
        # TODO(synk): add a padded Pallas path for non-foldable shapes.
        return x * gamma

    M = lead // fold
    x2d = x.reshape(M, Cf)
    gamma_row = jnp.tile(gamma, fold).reshape(1, Cf)

    itemsize = x2d.dtype.itemsize
    # dtype-native sublane packing: 8 rows f32, 16 bf16, 32 int8/fp8
    sub = max(8, 32 // itemsize)

    if target_block_bytes is None:
        target_block_bytes, vmem_limit_bytes = _chip_budget()
    else:
        vmem_limit_bytes = max(32 << 20, 4 * target_block_bytes + (1 << 20))

    rows_target = max(sub, (target_block_bytes // (Cf * itemsize)) // sub * sub)

    if M > sub:
        # Guarantee >= 2 grid steps (>= 8 when M is large) so both v7x
        # TensorCores get work and the DMA pipeline has steps to overlap.
        min_steps = 8 if M >= 8 * sub else 2
        cap = pl.cdiv(M, min_steps)
        cap = pl.cdiv(cap, sub) * sub  # round up to sublane multiple (< M here)
        tile_rows = min(rows_target, cap)
    else:
        tile_rows = M  # full-extent block (always legal, even if M < 8)

    out2d = _pallas_layer_scale_2d(
        x2d, gamma_row, tile_rows=tile_rows, vmem_limit_bytes=vmem_limit_bytes
    )
    return out2d.reshape(orig_shape)


if __name__ == "__main__":
    # Module config (deterministic init, as in LayerScale.__init__)
    chs = 32
    init_values = 1e-05
    gamma = jnp.full((chs,), init_values, dtype=jnp.float32)  # init_values * ones(chs)

    # Small example consistent with the module: batch=2, seq=8, hidden(chs)=32.
    key = jax.random.PRNGKey(0)
    x = jax.random.normal(key, (2, 8, chs), dtype=jnp.float32)

    # Force the Pallas path for this tiny example (default threshold would fall
    # back to the fused XLA multiply).
    out = layer_scale(x, gamma, min_elements_for_pallas=0)
    out = jax.block_until_ready(out)
    ref = x * gamma
    assert out.shape == x.shape
    assert jnp.allclose(out, ref, atol=1e-6, rtol=1e-6)

    # bf16 activations, multi-step row grid (exercises fold + sublane rounding).
    xb = jax.random.normal(jax.random.PRNGKey(0), (2, 512, chs), dtype=jnp.bfloat16)
    outb = jax.block_until_ready(layer_scale(xb, gamma, min_elements_for_pallas=0))
    refb = xb * gamma.astype(jnp.bfloat16)
    assert outb.shape == xb.shape
    assert jnp.allclose(
        outb.astype(jnp.float32), refb.astype(jnp.float32), atol=1e-2, rtol=1e-2
    )

    print("KERNEL_OK")
</pallas_src>

<mosaic_0001>
module attributes {stable_mosaic.version = 11 : i64} {
  func.func @_layer_scale_kernel(%arg0: i32, %arg1: memref<4x128xf32, #tpu.memory_space<vmem>>, %arg2: memref<1x128xf32, #tpu.memory_space<vmem>>, %arg3: memref<4x128xf32, #tpu.memory_space<vmem>>) attributes {dimension_semantics = [#tpu.dimension_semantics<parallel>], iteration_bounds = array<i64: 1>, scalar_prefetch = 0 : i64, scratch_operands = 0 : i64, tpu.core_type = #tpu.core_type<tc>, window_params = [{transform_indices = @transform_0, window_bounds = array<i64: 4, 128>}, {pipeline_mode = #tpu.pipeline_mode<synchronous>, transform_indices = @transform_1, window_bounds = array<i64: 1, 128>}, {transform_indices = @transform_2, window_bounds = array<i64: 4, 128>}]} {
    %c0 = arith.constant 0 : index
    %c0_0 = arith.constant 0 : index
    %0 = vector.load %arg1[%c0, %c0_0] : memref<4x128xf32, #tpu.memory_space<vmem>>, vector<4x128xf32>
    %c0_1 = arith.constant 0 : index
    %c0_2 = arith.constant 0 : index
    %1 = vector.load %arg2[%c0_1, %c0_2] : memref<1x128xf32, #tpu.memory_space<vmem>>, vector<1x128xf32>
    %2 = vector.broadcast %1 : vector<1x128xf32> to vector<4x128xf32>
    %3 = arith.mulf %0, %2 : vector<4x128xf32>
    %c0_3 = arith.constant 0 : index
    %c0_4 = arith.constant 0 : index
    %4 = vector.load %arg3[%c0_3, %c0_4] : memref<4x128xf32, #tpu.memory_space<vmem>>, vector<4x128xf32>
    tpu.vector_store %arg3[%c0_3, %c0_4], %3 {strides = array<i32>} : memref<4x128xf32, #tpu.memory_space<vmem>>, vector<4x128xf32>,
    return
  }
  func.func @transform_0(%arg0: i32) -> (i32, i32) {
    %c0_i32 = arith.constant 0 : i32
    %c0_i32_0 = arith.constant 0 : i32
    return %arg0, %c0_i32 : i32, i32
  }
  func.func @transform_1(%arg0: i32) -> (i32, i32) {
    %c0_i32 = arith.constant 0 : i32
    %c0_i32_0 = arith.constant 0 : i32
    %c0_i32_1 = arith.constant 0 : i32
    return %c0_i32, %c0_i32_0 : i32, i32
  }
  func.func @transform_2(%arg0: i32) -> (i32, i32) {
    %c0_i32 = arith.constant 0 : i32
    %c0_i32_0 = arith.constant 0 : i32
    return %arg0, %c0_i32 : i32, i32
  }
}

</mosaic_0001>

<bundles_post_ra>
// kernel: tpu_custom_call.1
= control target key start
LH: loop header
LB: loop body
LE: loop exit
PB: predicated region body
PF: predicated region fallthrough
CT: control target
= control target key end

     0   :  { %7 = vsyncpa [#allocation3], 0  ;;  %s144_s0 = inlined_call_operand.hbm [shape: f32[4,128], index: 0, kind: input, shape index: {}]   ;;  %s145_s1 = inlined_call_operand.vmem [shape: f32[1,128], index: 1, kind: input, shape index: {}]   ;;  %s146_s2 = inlined_call_operand.hbm [shape: f32[4,128], index: 2, kind: output, shape index: {}]  }
   0x1   :  { %8 = vsyncpa [#allocation4], 0  ;;  %s100_s9 = smov [#allocation2]   ;;  %s52_s13 = scalar_lea.hbm %s144_s0, 64 }
   0x2   :  { %s15_s10 = sshll.u32 %s100_s9, 4  ;;  %p53_p0 = scmp.ne.s32.totalorder %s144_s0, %s52_s13  ;;  %s16_s10 = int_to_ptr.vmem [resolvable:$true] %s15_s10 }
   0x3   :  { %p56_p1 = scmp.lt.u32.totalorder %s52_s13, %s144_s0 }
   0x5   :  { %p58_p2 = pnand %p56_p1, %p53_p0 }
   0x7   :  { %61 = shalt.err (!%p58_p2)
}
   0x8   :  { %s62_s18 = scalar_lea.vmem %s16_s10, 64  ;;  %p67_p4 = scmp.lt.s32.totalorder %s16_s10, %s16_s10 }
   0x9   :  { %p63_p3 = scmp.ne.s32.totalorder %s16_s10, %s62_s18  ;;  %p68_p5 = scmp.lt.s32.totalorder %s62_s18, %s62_s18 }
   0xb   :  { %p69_p6 = por %p68_p5, %p67_p4 }
   0xd   :  { %p70_p7 = pnand %p69_p6, %p63_p3 }
   0xf   :  { %73 = shalt.err (!%p70_p7)
}
  0x10   :  { %18 = dma.hbm_to_vmem [thread:$0]  %s144_s0, 64, %s16_s10, [#allocation3]  }
  0x11   :  { %96 = dma.done.wait [#allocation3], 64  }
  0x12   :  { %97 = vsyncadd [#allocation3], 4294967232  ;;  %s101_s21 = smov [#allocation5]   ;;  %v24_v0 = vld [vmem:[#allocation2] sm:$0xf] }
  0x13   :  { %s40_s22 = sshll.u32 %s101_s21, 4  ;;  %v49_v1 = vld [vmem:[%s145_s1] ss:$0 sm:$0xff]  ;;  %s41_s22 = int_to_ptr.vmem [resolvable:$true] %s40_s22 }
  0x14   :  { %v32_v2 = vmul.f32 %v49_v1, %v24_v0  ;;  %s74_s25 = scalar_lea.vmem %s41_s22, 64  ;;  %p79_p9 = scmp.lt.s32.totalorder %s41_s22, %s41_s22 }
  0x15   :  { %p75_p8 = scmp.ne.s32.totalorder %s41_s22, %s74_s25  ;;  %p80_p10 = scmp.lt.s32.totalorder %s74_s25, %s74_s25 }
  0x16   :  { %33 = vst [vmem:[#allocation5] sm:$0xf] %v32_v2 }
  0x17   :  { %p81_p11 = por %p80_p10, %p79_p9 }
  0x19   :  { %p82_p12 = pnand %p81_p11, %p75_p8 }
  0x1b   :  { %85 = shalt.err (!%p82_p12)
}
  0x1c   :  { %s86_s27 = scalar_lea.hbm %s146_s2, 64 }
  0x1d   :  { %p87_p13 = scmp.ne.s32.totalorder %s146_s2, %s86_s27  ;;  %p90_p0 = scmp.lt.u32.totalorder %s86_s27, %s146_s2 }
  0x1f   :  { %p92_p1 = pnand %p90_p0, %p87_p13 }
  0x21   :  { %95 = shalt.err (!%p92_p1)
}
  0x22   :  { %43 = dma.vmem_to_hbm [thread:$0]  %s41_s22, 64, %s146_s2, [#allocation4]  }
  0x23   :  { %98 = dma.done.wait [#allocation4], 64  }
  0x24   :  { %99 = vsyncadd [#allocation4], 4294967232 }
  0x25   :  { %47 = vsyncpa [#allocation3], 1 }
  0x26   :  { %48 = vsyncpa [#allocation4], 1 }

</bundles_post_ra>
